<compile_context>
chip_gen: v6e
topology: v6e:2x2x1
jax: 0.10.0
libtpu: 0.0.40
codegen_flags: <defaults>
</compile_context>

<pallas_src>
import functools

import jax
import jax.numpy as jnp
from jax.experimental import pallas as pl
from jax.experimental.pallas import tpu as pltpu

OUT_LANES = 128  # lane-dense output slab width (>= 1 + num_actions)


def actor_critic_kernel(state_ref, w1p_ref, w2p_ref, out_ref, *, num_actions):
    # ---- fused first layer (critic | actor): one MXU pass, f32 accumulate ----
    # state_ref already carries a ones column, so the bias is row NI of w1p.
    sa = state_ref[...].astype(jnp.bfloat16)                         # (TB, NI+1)
    h = jnp.tanh(jnp.dot(sa, w1p_ref[...],
                         preferred_element_type=jnp.float32))        # (TB, H2A) f32

    # Force the "ones" lane so the last row of w2p acts as the layer-2 bias.
    h2a = h.shape[1]
    lane_h = jax.lax.broadcasted_iota(jnp.int32, h.shape, dimension=1)
    h_aug = jnp.where(lane_h == h2a - 1, 1.0, h)

    # ---- fused block-diagonal second layer, lane-dense (TB, 128) result ----
    #   lane 0 = critic value, lanes 1..A = actor logits, lanes > A = 0
    z = jnp.dot(h_aug.astype(jnp.bfloat16), w2p_ref[...],
                preferred_element_type=jnp.float32)                  # (TB, 128) f32

    lane = jax.lax.broadcasted_iota(jnp.int32, z.shape, dimension=1)
    is_logit = (lane >= 1) & (lane <= num_actions)

    # Masked, numerically-stable softmax over the logit lanes only.
    zl = jnp.where(is_logit, z, -jnp.inf)
    m = jnp.max(zl, axis=1, keepdims=True)
    p = jnp.exp(zl - m)                                  # masked lanes -> exp(-inf) = 0
    denom = jnp.sum(p, axis=1, keepdims=True)
    probs = p * pl.reciprocal(denom, approx=False)       # exact: keeps sum(probs) ~= 1

    # Single lane-dense bf16 slab: value in lane 0, probs in lanes 1..A, 0 elsewhere.
    out_ref[...] = jnp.where(lane == 0, z, probs).astype(out_ref.dtype)


def pack_params(params, out_lanes=OUT_LANES, dtype=jnp.bfloat16):
    """Fuse the 4 Linear layers into 2 packed matrices with biases folded in.

    w1p : (num_inputs+1, H2A)  columns = [critic_l1 | actor_l1 | zero pad];
                               last row = layer-1 biases (paired with the ones
                               column appended to the state).
    w2p : (H2A, out_lanes)     block-diagonal: wc2 -> lane 0, wa2 -> lanes 1..A;
                               last row = layer-2 biases (paired with the ones
                               lane forced into the tanh output).
    H2A = 2*hidden + 1 (ones lane), padded up to a multiple of 8.
    Weight layout is (in_features, out_features), i.e. PyTorch weights transposed.
    """
    ni, h = params["wc1"].shape
    a = params["wa2"].shape[1]
    assert 1 + a <= out_lanes, "num_actions + 1 must fit in the output lane slab"
    h2 = 2 * h
    h2a = ((h2 + 1 + 7) // 8) * 8

    w1p = jnp.zeros((ni + 1, h2a), jnp.float32)
    w1p = w1p.at[:ni, :h].set(params["wc1"])
    w1p = w1p.at[:ni, h:h2].set(params["wa1"])
    w1p = w1p.at[ni, :h].set(params["bc1"][0])
    w1p = w1p.at[ni, h:h2].set(params["ba1"][0])

    w2p = jnp.zeros((h2a, out_lanes), jnp.float32)
    w2p = w2p.at[:h, 0:1].set(params["wc2"])                    # critic head -> lane 0
    w2p = w2p.at[h:h2, 1:1 + a].set(params["wa2"])              # actor head  -> lanes 1..A
    w2p = w2p.at[h2a - 1, 0].set(params["bc2"][0, 0])           # biases live in the
    w2p = w2p.at[h2a - 1, 1:1 + a].set(params["ba2"][0])        # "ones" row

    return w1p.astype(dtype), w2p.astype(dtype)


def _pick_tile_b(B, tile_b=None):
    """Batch tile: large (512-1024) to amortize per-step overhead, but >= 2 grid
    steps when the batch allows so both v7x TensorCores get work. Tiny/odd
    batches run as a single block (fewer, larger steps is optimal on 1-TC chips)."""
    if tile_b is not None:
        assert B % tile_b == 0, "pad the batch to a multiple of tile_b"
        return tile_b
    if B < 32 or B % 16 != 0:
        return B
    cap = min(1024, B // 2)
    for cand in range(cap - cap % 16, 15, -16):       # multiples of 16 (bf16 sublane tile)
        if B % cand == 0:
            return cand
    return B


def actor_critic_forward(state, w1p, w2p, num_actions, *, tile_b=None):
    """Returns (value[B], probs[B, num_actions]) matching ActorCritic.forward."""
    B = state.shape[0]
    ni_aug = w1p.shape[0]          # num_inputs + 1 (ones column)
    out_lanes = w2p.shape[1]

    # Fold the layer-1 bias into the MXU pass via a ones column.
    # TODO(synk): in a real RL loop, build the ones column where `state` is
    # constructed so this concat isn't a separate XLA op per call.
    state_aug = jnp.concatenate([state, jnp.ones((B, 1), state.dtype)], axis=1)
    assert state_aug.shape[1] == ni_aug

    tile_b = _pick_tile_b(B, tile_b)
    grid = (B // tile_b,)

    # VMEM note: with tile_b <= 1024 the double-buffered state (<64 KiB) +
    # bf16 output tile (<=512 KiB) + resident weights are far under the default
    # scoped VMEM limit on all chips, so no explicit vmem_limit_bytes needed.
    out = pl.pallas_call(
        functools.partial(actor_critic_kernel, num_actions=num_actions),
        out_shape=jax.ShapeDtypeStruct((B, out_lanes), jnp.bfloat16),
        grid_spec=pltpu.PrefetchScalarGridSpec(
            num_scalar_prefetch=0,
            grid=grid,
            in_specs=[
                pl.BlockSpec((tile_b, ni_aug), lambda i: (i, 0)),   # state tile streams
                pl.BlockSpec(w1p.shape, lambda i: (0, 0)),          # packed weights stay resident
                pl.BlockSpec(w2p.shape, lambda i: (0, 0)),
            ],
            out_specs=pl.BlockSpec((tile_b, out_lanes), lambda i: (i, 0)),
        ),
        compiler_params=pltpu.CompilerParams(
            dimension_semantics=("parallel",)),   # batch axis shards across v7x TCs
    )(state_aug, w1p, w2p)

    value = out[:, 0].astype(jnp.float32)                 # critic_linear2(hidden)[:, 0]
    probs = out[:, 1:1 + num_actions].astype(jnp.float32)  # softmax over actor logits
    return value, probs


def init_params(key, num_inputs, num_actions, hidden_size):
    """PyTorch-style uniform(-1/sqrt(fan_in), 1/sqrt(fan_in)) init, deterministic."""
    def linear(key, fan_in, fan_out):
        kw, kb = jax.random.split(key)
        bound = 1.0 / jnp.sqrt(float(fan_in))
        w = jax.random.uniform(kw, (fan_in, fan_out), jnp.float32, -bound, bound)
        b = jax.random.uniform(kb, (1, fan_out), jnp.float32, -bound, bound)
        return w, b

    k1, k2, k3, k4 = jax.random.split(key, 4)
    wc1, bc1 = linear(k1, num_inputs, hidden_size)
    wc2, bc2 = linear(k2, hidden_size, 1)
    wa1, ba1 = linear(k3, num_inputs, hidden_size)
    wa2, ba2 = linear(k4, hidden_size, num_actions)
    return dict(wc1=wc1, bc1=bc1, wc2=wc2, bc2=bc2,
                wa1=wa1, ba1=ba1, wa2=wa2, ba2=ba2)


def reference_forward(state, p):
    """Pure-JAX f32 reference reproducing the PyTorch module exactly."""
    hc = jnp.tanh(state @ p["wc1"] + p["bc1"])
    value = (hc @ p["wc2"] + p["bc2"])[:, 0]
    ha = jnp.tanh(state @ p["wa1"] + p["ba1"])
    h = ha @ p["wa2"] + p["ba2"]
    h = h - jnp.max(h, axis=1, keepdims=True)
    logp = h - jnp.log(jnp.sum(jnp.exp(h), axis=1, keepdims=True))
    return value, jnp.exp(logp)


if __name__ == "__main__":
    # Small shapes consistent with the env-driven module:
    #   num_inputs = observation dim, num_actions = discrete action count.
    B, NUM_INPUTS, NUM_ACTIONS, HIDDEN = 8, 4, 6, 40

    key = jax.random.PRNGKey(0)
    k_params, k_state = jax.random.split(key)
    params = init_params(k_params, NUM_INPUTS, NUM_ACTIONS, HIDDEN)
    w1p, w2p = pack_params(params)          # one-time host-side fusion/packing (bf16)
    state = jax.random.normal(k_state, (B, NUM_INPUTS), jnp.float32)

    value, probs = actor_critic_forward(state, w1p, w2p, NUM_ACTIONS)
    value = jax.block_until_ready(value)
    probs = jax.block_until_ready(probs)

    value_ref, probs_ref = reference_forward(state, params)
    assert value.shape == (B,) and probs.shape == (B, NUM_ACTIONS)
    # Tolerances absorb bf16 MXU operands + bf16 output slab
    # (acceptable for an RL policy/value head, per perf review).
    assert jnp.allclose(value, value_ref, atol=5e-2, rtol=5e-2)
    assert jnp.allclose(probs, probs_ref, atol=2e-2, rtol=2e-2)
    assert jnp.allclose(jnp.sum(probs, axis=1), 1.0, atol=1e-2)

    print("KERNEL_OK")
</pallas_src>

<mosaic_0001>
module attributes {stable_mosaic.version = 11 : i64} {
  func.func @actor_critic_kernel(%arg0: i32, %arg1: memref<8x5xf32, #tpu.memory_space<vmem>>, %arg2: memref<5x88xbf16, #tpu.memory_space<vmem>>, %arg3: memref<88x128xbf16, #tpu.memory_space<vmem>>, %arg4: memref<8x128xbf16, #tpu.memory_space<vmem>>) attributes {dimension_semantics = [#tpu.dimension_semantics<parallel>], iteration_bounds = array<i64: 1>, scalar_prefetch = 0 : i64, scratch_operands = 0 : i64, tpu.core_type = #tpu.core_type<tc>, window_params = [{transform_indices = @transform_0, window_bounds = array<i64: 8, 5>}, {pipeline_mode = #tpu.pipeline_mode<synchronous>, transform_indices = @transform_1, window_bounds = array<i64: 5, 88>}, {pipeline_mode = #tpu.pipeline_mode<synchronous>, transform_indices = @transform_2, window_bounds = array<i64: 88, 128>}, {transform_indices = @transform_3, window_bounds = array<i64: 8, 128>}]} {
    %c0 = arith.constant 0 : index
    %c0_0 = arith.constant 0 : index
    %0 = vector.load %arg1[%c0, %c0_0] : memref<8x5xf32, #tpu.memory_space<vmem>>, vector<8x5xf32>
    %1 = arith.truncf %0 : vector<8x5xf32> to vector<8x5xbf16>
    %c0_1 = arith.constant 0 : index
    %c0_2 = arith.constant 0 : index
    %2 = vector.load %arg2[%c0_1, %c0_2] : memref<5x88xbf16, #tpu.memory_space<vmem>>, vector<5x88xbf16>
    %cst = arith.constant dense<0.000000e+00> : vector<8x88xf32>
    %3 = tpu.matmul %1, %2, %cst {dimension_numbers = #tpu.dot_dimension_numbers<[1], [0], [0], [1], [0, 0, 1, 1], [], []>} : vector<8x5xbf16>, vector<5x88xbf16>, vector<8x88xf32> -> vector<8x88xf32>
    %4 = math.tanh %3 : vector<8x88xf32>
    %5 = tpu.iota {dimensions = array<i32: 1>} : vector<8x88xi32>
    %c87_i32 = arith.constant 87 : i32
    %6 = vector.broadcast %c87_i32 : i32 to vector<8x88xi32>
    %7 = arith.cmpi eq, %5, %6 : vector<8x88xi32>
    %cst_3 = arith.constant 1.000000e+00 : f32
    %8 = vector.broadcast %cst_3 : f32 to vector<8x88xf32>
    %9 = arith.select %7, %8, %4 : vector<8x88xi1>, vector<8x88xf32>
    %10 = arith.truncf %9 : vector<8x88xf32> to vector<8x88xbf16>
    %c0_4 = arith.constant 0 : index
    %c0_5 = arith.constant 0 : index
    %11 = vector.load %arg3[%c0_4, %c0_5] : memref<88x128xbf16, #tpu.memory_space<vmem>>, vector<88x128xbf16>
    %cst_6 = arith.constant dense<0.000000e+00> : vector<8x128xf32>
    %12 = tpu.matmul %10, %11, %cst_6 {dimension_numbers = #tpu.dot_dimension_numbers<[1], [0], [0], [1], [0, 0, 1, 1], [], []>} : vector<8x88xbf16>, vector<88x128xbf16>, vector<8x128xf32> -> vector<8x128xf32>
    %13 = tpu.iota {dimensions = array<i32: 1>} : vector<8x128xi32>
    %c1_i32 = arith.constant 1 : i32
    %14 = vector.broadcast %c1_i32 : i32 to vector<8x128xi32>
    %15 = arith.cmpi sge, %13, %14 : vector<8x128xi32>
    %c6_i32 = arith.constant 6 : i32
    %16 = vector.broadcast %c6_i32 : i32 to vector<8x128xi32>
    %17 = arith.cmpi sle, %13, %16 : vector<8x128xi32>
    %18 = arith.andi %15, %17 : vector<8x128xi1>
    %cst_7 = arith.constant 0xFF800000 : f32
    %19 = vector.broadcast %cst_7 : f32 to vector<8x128xf32>
    %20 = arith.select %18, %12, %19 : vector<8x128xi1>, vector<8x128xf32>
    %cst_8 = arith.constant dense<0xFF800000> : vector<8xf32>
    %21 = vector.multi_reduction <maximumf>, %20, %cst_8 [1] : vector<8x128xf32> to vector<8xf32>
    %22 = vector.shape_cast %21 : vector<8xf32> to vector<8x1xf32>
    %23 = vector.broadcast %22 : vector<8x1xf32> to vector<8x128xf32>
    %24 = arith.subf %20, %23 : vector<8x128xf32>
    %25 = math.exp %24 : vector<8x128xf32>
    %cst_9 = arith.constant dense<0.000000e+00> : vector<8xf32>
    %26 = vector.multi_reduction <add>, %25, %cst_9 [1] : vector<8x128xf32> to vector<8xf32>
    %27 = vector.shape_cast %26 : vector<8xf32> to vector<8x1xf32>
    %28 = tpu.reciprocal %27 : vector<8x1xf32> -> vector<8x1xf32>
    %29 = vector.broadcast %28 : vector<8x1xf32> to vector<8x128xf32>
    %30 = arith.mulf %25, %29 : vector<8x128xf32>
    %c0_i32 = arith.constant 0 : i32
    %31 = vector.broadcast %c0_i32 : i32 to vector<8x128xi32>
    %32 = arith.cmpi eq, %13, %31 : vector<8x128xi32>
    %33 = arith.select %32, %12, %30 : vector<8x128xi1>, vector<8x128xf32>
    %34 = arith.truncf %33 : vector<8x128xf32> to vector<8x128xbf16>
    %c0_10 = arith.constant 0 : index
    %c0_11 = arith.constant 0 : index
    %35 = vector.load %arg4[%c0_10, %c0_11] : memref<8x128xbf16, #tpu.memory_space<vmem>>, vector<8x128xbf16>
    tpu.vector_store %arg4[%c0_10, %c0_11], %34 {strides = array<i32>} : memref<8x128xbf16, #tpu.memory_space<vmem>>, vector<8x128xbf16>,
    return
  }
  func.func @transform_0(%arg0: i32) -> (i32, i32) {
    %c0_i32 = arith.constant 0 : i32
    %c0_i32_0 = arith.constant 0 : i32
    return %arg0, %c0_i32 : i32, i32
  }
  func.func @transform_1(%arg0: i32) -> (i32, i32) {
    %c0_i32 = arith.constant 0 : i32
    %c0_i32_0 = arith.constant 0 : i32
    %c0_i32_1 = arith.constant 0 : i32
    return %c0_i32, %c0_i32_0 : i32, i32
  }
  func.func @transform_2(%arg0: i32) -> (i32, i32) {
    %c0_i32 = arith.constant 0 : i32
    %c0_i32_0 = arith.constant 0 : i32
    %c0_i32_1 = arith.constant 0 : i32
    return %c0_i32, %c0_i32_0 : i32, i32
  }
  func.func @transform_3(%arg0: i32) -> (i32, i32) {
    %c0_i32 = arith.constant 0 : i32
    %c0_i32_0 = arith.constant 0 : i32
    return %arg0, %c0_i32 : i32, i32
  }
}

</mosaic_0001>

<bundles_post_ra>
// kernel: tpu_custom_call.1
= control target key start
LH: loop header
LB: loop body
LE: loop exit
PB: predicated region body
PF: predicated region fallthrough
CT: control target
= control target key end

     0   :  { %8 = vsyncpa [#allocation3], 0  ;;  %s425_s0 = inlined_call_operand.hbm [shape: f32[8,5], index: 0, kind: input, shape index: {}]   ;;  %s426_s1 = inlined_call_operand.hbm [shape: bf16[5,88], index: 1, kind: input, shape index: {}]   ;;  %s427_s2 = inlined_call_operand.hbm [shape: bf16[88,128], index: 2, kind: input, shape index: {}]   ;;  %s428_s3 = inlined_call_operand.hbm [shape: bf16[8,128], index: 3, kind: output, shape index: {}]  }
   0x1   :  { %9 = vsyncpa [#allocation6], 0 }
   0x2   :  { %10 = vsyncpa [#allocation4], 0  ;;  %s384_s12 = smov [#allocation5]   ;;  %s385_s14 = smov [#allocation2]  }
   0x3   :  { %s27_s13 = sshll.u32 %s384_s12, 4  ;;  %s17_s15 = sshll.u32 %s385_s14, 4  ;;  %s28_s13 = int_to_ptr.vmem [resolvable:$true] %s27_s13  ;;  %s18_s15 = int_to_ptr.vmem [resolvable:$true] %s17_s15 }
   0x4   :  { %s306_s16 = scalar_lea.vmem %s28_s13, 64  ;;  %p311_p1 = scmp.lt.s32.totalorder %s28_s13, %s28_s13 }
   0x5   :  { %p307_p0 = scmp.ne.s32.totalorder %s28_s13, %s306_s16  ;;  %p312_p2 = scmp.lt.s32.totalorder %s306_s16, %s306_s16 }
   0x7   :  { %p313_p3 = por %p312_p2, %p311_p1 }
   0x9   :  { %p314_p4 = pnand %p313_p3, %p307_p0 }
   0xb   :  { %317 = shalt.err (!%p314_p4)
}
   0xc   :  { %30 = dma.hbm_to_vmem [thread:$0]  %s426_s1, 64, %s28_s13, [#allocation6]  }
   0xd   :  { %s326_s19 = scalar_lea.vmem %s18_s15, 128  ;;  %p331_p6 = scmp.lt.s32.totalorder %s18_s15, %s18_s15 }
   0xe   :  { %p327_p5 = scmp.ne.s32.totalorder %s18_s15, %s326_s19  ;;  %p332_p7 = scmp.lt.s32.totalorder %s326_s19, %s326_s19 }
  0x10   :  { %p333_p8 = por %p332_p7, %p331_p6 }
  0x12   :  { %p334_p9 = pnand %p333_p8, %p327_p5 }
  0x14   :  { %337 = shalt.err (!%p334_p9)
}
  0x15   :  { %20 = dma.hbm_to_vmem [thread:$0]  %s425_s0, 128, %s18_s15, [#allocation3]  }
  0x16   :  { %s386_s22 = smov [#allocation7]  }
  0x17   :  { %s36_s23 = sshll.u32 %s386_s22, 4  ;;  %s37_s23 = int_to_ptr.vmem [resolvable:$true] %s36_s23 }
  0x18   :  { %s346_s24 = scalar_lea.vmem %s37_s23, 704  ;;  %p351_p11 = scmp.lt.s32.totalorder %s37_s23, %s37_s23 }
  0x19   :  { %p347_p10 = scmp.ne.s32.totalorder %s37_s23, %s346_s24  ;;  %p352_p12 = scmp.lt.s32.totalorder %s346_s24, %s346_s24 }
  0x1b   :  { %p353_p13 = por %p352_p12, %p351_p11 }
  0x1d   :  { %p354_p0 = pnand %p353_p13, %p347_p10 }
  0x1f   :  { %357 = shalt.err (!%p354_p0)
}
  0x20   :  { %s387_s1 = smov 64   ;;  %s388_s25 = smov 4  }
  0x21   :  { %42 = dma.hbm_to_vmem [thread:$0]  %s427_s2, 704, %s37_s23, [#allocation6], %s387_s1, %s387_s1, %s388_s25  }
  0x22   :  { %378 = dma.done.wait [#allocation3], 128  }
  0x23   :  { %379 = vsyncadd [#allocation3], 4294967168 }
  0x24   :  { %380 = dma.done.wait [#allocation6], 768  }
  0x25   :  { %381 = vsyncadd [#allocation6], 4294966528  ;;  %vm60_vm0 = vcmask 1041408   ;;  %v389_v0 = vmov 0.0   ;;  %vm61_vm1 = vcmask 1042432   ;;  %v390_v1 = vmov 65535  }
  0x26   :  { %255 = vmatprep.subr.bf16.mxu0 %v389_v0  ;;  %261 = vmatprep.subr.bf16.mxu1 %v389_v0  ;;  %v62_v2 = vsel %vm60_vm0, 4294967295, %v390_v1  ;;  %vm391_vm2 = vmmov 0   ;;  %v55_v4 = vld [vmem:[#allocation5] sm:$0x7]  ;;  %v53_v5 = vld [vmem:[#allocation2] sm:$0xff]  ;;  %vm161_vm3 = vcmask 1043456   ;;  %v108_v18 = vlaneseq }
  0x27   :  { %257 = vmatprep.mubr.msk.bf16.mxu0 %vm391_vm2, %v389_v0  ;;  %273 = vmatprep.mubr.msk.bf16.mxu1 %vm391_vm2, %v389_v0  ;;  %v63_v3 = vsel %vm61_vm1, %v62_v2, 0  ;;  %v286_v7 = vld [vmem:[#allocation7 + $0x28] ss:$0 sps:$4 sm:$0xff]   ;;  %v54_v8 = vpack.c.bf16 %v53_v5, %v53_v5  ;;  %vm56_vm4 = vcmask 39936   ;;  %v287_v10 = vld [vmem:[#allocation7 + $0x20] sm:$0xff]   ;;  %v288_v11 = vld [vmem:[#allocation7 + $0x18] sm:$0xff]  }
  0x28   :  { %v65_v6 = vand.u32 %v63_v3, %v55_v4  ;;  %v163_v9 = vsel %vm161_vm3, %v286_v7, 0  ;;  %v289_v12 = vld [vmem:[#allocation7 + $0x10] sm:$0xff]   ;;  %v290_v13 = vld [vmem:[#allocation7 + $0x8] sm:$0xff]   ;;  %v291_v14 = vld [vmem:[#allocation7] sm:$0xff]   ;;  %v109_v20 = vand.u32 127, %v108_v18  ;;  %vm157_vm6 = vcmask 719872  }
  0x29   :  { %262 = vmatpush3.bf16.msra.mxu1 %v163_v9  ;;  %s392_s0 = smov [#allocation8]  }
  0x2a   :  { %256 = vmatpush3.bf16.msra.mxu0 %v65_v6  ;;  %263 = vmatprep.subr.bf16.mxu1 %v389_v0  ;;  %vm110_vm5 = vcmp.eq.s32.totalorder %v109_v20, 87  ;;  %vm205_vm7 = vcmp.ge.s32.totalorder %v109_v20, 1  ;;  %vm206_vm8 = vcmp.le.s32.totalorder %v109_v20, 6  ;;  %vm218_vm10 = vcmp.eq.s32.totalorder %v109_v20, 0  ;;  %s228_s2 = sshll.u32 %s392_s0, 4  ;;  %s229_s2 = int_to_ptr.vmem [resolvable:$true] %s228_s2 }
  0x2b   :  { %vm207_vm9 = vmand %vm205_vm7, %vm206_vm8  ;;  %s358_s28 = scalar_lea.vmem %s229_s2, 64  ;;  %p363_p2 = scmp.lt.s32.totalorder %s229_s2, %s229_s2 }
  0x2c   :  { %p359_p1 = scmp.ne.s32.totalorder %s229_s2, %s358_s28  ;;  %p364_p3 = scmp.lt.s32.totalorder %s358_s28, %s358_s28 }
  0x2d   :  { %258 = vmatmul.mubr.msk.bf16.vlgmr.msra.gmra.mxu0 %vm56_vm4, %v54_v8  ;;  %264 = vmatpush3.bf16.msra.mxu1 %v287_v10 }
  0x2e   :  { %265 = vmatprep.subr.bf16.mxu1 %v389_v0  ;;  %p365_p4 = por %p364_p3, %p363_p2 }
  0x30   :  { %p366_p5 = pnand %p365_p4, %p359_p1 }
  0x31   :  { %266 = vmatpush3.bf16.msra.mxu1 %v288_v11 }
  0x32   :  { %267 = vmatprep.subr.bf16.mxu1 %v389_v0 }
  0x35   :  { %268 = vmatpush3.bf16.msra.mxu1 %v289_v12 }
  0x36   :  { %269 = vmatprep.subr.bf16.mxu1 %v389_v0 }
  0x39   :  { %270 = vmatpush3.bf16.msra.mxu1 %v290_v13 }
  0x3a   :  { %271 = vmatprep.subr.bf16.mxu1 %v389_v0 }
  0x3d   :  { %272 = vmatpush3.bf16.msra.mxu1 %v291_v14 }
  0xed   :  { %v101_v15 = vpop.f32.mrf.mxu0 }
  0xee   :  { %292 = vtanh.f32 %v101_v15 }
  0xef   :  { %v259_v16 = vpop.f32.mrf.mxu0 }
  0xf1   :  { %v104_v17 = vpop.f32.mrf.mxu0 }
  0xf3   :  { %v260_v19 = vpop.f32.mrf.mxu0 }
  0xfb   :  { %v293_v21 = vpop.eup %292 }
  0xfc   :  { %v111_v22 = vsel %vm110_vm5, 1.0, %v293_v21 }
  0xfd   :  { %v112_v23 = vpack.c.bf16 %v111_v22, %v111_v22 }
  0xff   :  { %274 = vmatmul.mubr.msk.bf16.vlgmr.msra.gmra.mxu1 %vm157_vm6, %v112_v23 }
 0x1bf   :  { %v199_v24 = vpop.f32.mrf.mxu1 }
 0x1c0   :  { %v208_v25 = vsel %vm207_vm9, %v199_v24, -inf }
 0x1c1   :  { %209 = vmax.xlane.f32.xlu0 %v208_v25  ;;  %v275_v26 = vpop.f32.mrf.mxu1 }
 0x1c3   :  { %v202_v27 = vpop.f32.mrf.mxu1 }
 0x1c5   :  { %v276_v28 = vpop.f32.mrf.mxu1 }
 0x24a   :  { %v210_v29 = vpop.xlane.xlu0 %209 }
 0x24b   :  { %v211_v30 = vsub.f32 %v208_v25, %v210_v29 }
 0x24d   :  { %v212_v31 = vmul.f32 1.442695, %v211_v30 }
 0x24f   :  { %294 = vpow2.f32 %v212_v31 }
 0x25c   :  { %v295_v32 = vpop.eup %294 }
 0x25d   :  { %214 = vadd.xlane.f32.xlu0 %v295_v32 }
 0x2e6   :  { %v215_v33 = vpop.xlane.xlu0 %214 }
 0x2e7   :  { %296 = vrcp.f32 %v215_v33 }
 0x2f4   :  { %v297_v34 = vpop.eup %296 }
 0x2f5   :  { %v217_v35 = vmul.f32 %v297_v34, %v295_v32 }
 0x2f7   :  { %v219_v36 = vsel %vm218_vm10, %v199_v24, %v217_v35 }
 0x2f8   :  { %v220_v37 = vpack.c.bf16 %v219_v36, %v219_v36 }
 0x2fa   :  { %221 = vst [vmem:[#allocation8] sm:$0xf] %v220_v37 }
 0x2fb   :  { %369 = shalt.err (!%p366_p5)
}
 0x2fc   :  { %231 = dma.vmem_to_hbm [thread:$0]  %s229_s2, 64, %s428_s3, [#allocation4]  }
 0x2fd   :  { %382 = dma.done.wait [#allocation4], 64  }
 0x2fe   :  { %383 = vsyncadd [#allocation4], 4294967232 }
 0x2ff   :  { %235 = vsyncpa [#allocation3], 1 }
 0x300   :  { %236 = vsyncpa [#allocation6], 1 }
 0x301   :  { %237 = vsyncpa [#allocation4], 1 }

</bundles_post_ra>
